<compile_context>
chip_gen: v7x
topology: tpu7x:2x2x1
jax: 0.10.0
libtpu: 0.0.40
codegen_flags: <defaults>
</compile_context>

<pallas_src>
import math
import jax
import jax.numpy as jnp
from jax import lax
from jax.experimental import pallas as pl
from jax.experimental.pallas import tpu as pltpu


def _round_up(x, m):
    return ((x + m - 1) // m) * m


def rnn_fused_kernel(tok_ref, w_ihT_ref, b_rnn_ref, h0_ref, w_hhT_ref,
                     w_linT_ref, b_lin_ref,
                     out_ref, hN_ref,
                     h_scratch, y_scratch):
    """One grid step processes a chunk of K time steps.

    tok_ref   : (K*Bp, 1) int32  token id per (time, padded-batch) row; -1 for pad rows
    w_ihT_ref : (Vp, Hp)         W_ih^T (zero padded)
    b_rnn_ref : (1, Hp)          b_ih + b_hh (zero padded)
    h0_ref    : (Bp, Hp)         initial hidden state
    w_hhT_ref : (Hp, Hp)         W_hh^T
    w_linT_ref: (Hp, Vp)         W_lin^T
    b_lin_ref : (1, Vp)          Linear bias
    out_ref   : (K*Bp, Vp)       logits for this chunk (time-major rows)
    hN_ref    : (Bp, Hp)         final hidden state (grid-resident output)
    h_scratch : (Bp, Hp)         carried hidden state across chunks
    y_scratch : (K, Bp, Hp)      gi staging, overwritten in place with Y
    """
    @pl.when(pl.program_id(0) == 0)
    def _():
        h_scratch[...] = h0_ref[...]

    K, Bp, Hp = y_scratch.shape
    KB = K * Bp
    Vp = w_ihT_ref.shape[0]

    # --- Input projection for the whole chunk as ONE MXU matmul -----------------
    # one-hot built in-kernel: row r activates lane tok[r] (pad rows: -1 -> all 0).
    lane = lax.broadcasted_iota(jnp.int32, (KB, Vp), 1)
    onehot = (tok_ref[...] == lane).astype(jnp.float32)              # (KB, Vp)
    gi = (jnp.dot(onehot, w_ihT_ref[...], preferred_element_type=jnp.float32)
          + b_rnn_ref[...])                                          # (KB, Hp)
    y_scratch[...] = gi.reshape(K, Bp, Hp)

    # --- Sequential recurrence (only the truly serial work) --------------------
    def step(k, h_prev):
        h_new = jnp.tanh(
            y_scratch[k]
            + jnp.dot(h_prev, w_hhT_ref[...], preferred_element_type=jnp.float32))
        y_scratch[k] = h_new                                          # gi -> Y in place
        return h_new

    h_last = lax.fori_loop(0, K, step, h_scratch[...], unroll=True)
    h_scratch[...] = h_last
    hN_ref[...] = h_last          # unconditional write every chunk: safe and cheap

    # --- Batched Linear head over all K*Bp rows (single MXU matmul) ------------
    y2 = y_scratch[...].reshape(KB, Hp)
    out_ref[...] = (jnp.dot(y2, w_linT_ref[...], preferred_element_type=jnp.float32)
                    + b_lin_ref[...])


def rnn_model_forward(inputs, state, params, vocab_size, num_hiddens,
                      chunk_size=None):
    """inputs: (B, T) int32 token ids; state: (1, B, H) float32.

    Returns (output (T*B, V) float32, new_state (1, B, H) float32), matching
    RNNModel.forward.
    """
    B, T = inputs.shape
    H, V = num_hiddens, vocab_size
    w_ih, w_hh, b_ih, b_hh, w_lin, b_lin = params

    # Lane/sublane-dense padded dims.
    Bp = _round_up(max(B, 8), 8)
    Hp = _round_up(H, 128)
    Vp = _round_up(V, 128)

    K = T if chunk_size is None else chunk_size
    assert T % K == 0, "chunk_size must divide T"

    # ---- Token ids, time-major, batch padded with -1 (-> zero one-hot row) ----
    tok = jnp.pad(inputs.T.astype(jnp.int32), ((0, 0), (0, Bp - B)),
                  constant_values=-1)                       # (T, Bp)
    tok = tok.reshape(T * Bp, 1)

    # ---- Zero-pad weights/state to (sublane=8, lane=128)-aligned shapes -------
    w_ihT = jnp.pad(w_ih.T, ((0, Vp - V), (0, Hp - H)))
    b_rnn = jnp.pad((b_ih[0] + b_hh[0]).reshape(1, H), ((0, 0), (0, Hp - H)))
    h0 = jnp.pad(state[0], ((0, Bp - B), (0, Hp - H)))
    w_hhT = jnp.pad(w_hh.T, ((0, Hp - H), (0, Hp - H)))
    w_linT = jnp.pad(w_lin.T, ((0, Hp - H), (0, Vp - V)))
    b_lin_p = jnp.pad(b_lin, ((0, 0), (0, Vp - V)))

    grid_spec = pltpu.PrefetchScalarGridSpec(
        num_scalar_prefetch=0,
        grid=(T // K,),
        in_specs=[
            pl.BlockSpec((K * Bp, 1), lambda c: (c, 0)),     # token ids (chunk)
            pl.BlockSpec((Vp, Hp), lambda c: (0, 0)),        # W_ih^T
            pl.BlockSpec((1, Hp), lambda c: (0, 0)),         # b_ih + b_hh
            pl.BlockSpec((Bp, Hp), lambda c: (0, 0)),        # h0
            pl.BlockSpec((Hp, Hp), lambda c: (0, 0)),        # W_hh^T
            pl.BlockSpec((Hp, Vp), lambda c: (0, 0)),        # W_lin^T
            pl.BlockSpec((1, Vp), lambda c: (0, 0)),         # b_lin
        ],
        out_specs=[
            pl.BlockSpec((K * Bp, Vp), lambda c: (c, 0)),    # logits (lane-dense)
            pl.BlockSpec((Bp, Hp), lambda c: (0, 0)),        # final hidden state
        ],
        scratch_shapes=[
            pltpu.VMEM((Bp, Hp), jnp.float32),               # carried hidden state
            pltpu.VMEM((K, Bp, Hp), jnp.float32),            # gi / Y buffer (in place)
        ],
    )

    logits_pad, hN_pad = pl.pallas_call(
        rnn_fused_kernel,
        out_shape=(
            jax.ShapeDtypeStruct((T * Bp, Vp), jnp.float32),
            jax.ShapeDtypeStruct((Bp, Hp), jnp.float32),
        ),
        grid_spec=grid_spec,
        compiler_params=pltpu.CompilerParams(
            dimension_semantics=("arbitrary",)),             # time is sequential
    )(tok, w_ihT, b_rnn, h0, w_hhT, w_linT, b_lin_p)

    # Strip padding.
    output = logits_pad.reshape(T, Bp, Vp)[:, :B, :V].reshape(T * B, V)
    h_final = hN_pad[:B, :H].reshape(1, B, H)
    return output, h_final


def init_params(key, vocab_size, num_hiddens):
    """PyTorch-style uniform(-1/sqrt(H), 1/sqrt(H)) init."""
    H, V = num_hiddens, vocab_size
    ks = jax.random.split(key, 6)
    bound = 1.0 / math.sqrt(H)
    w_ih = jax.random.uniform(ks[0], (H, V), jnp.float32, -bound, bound)
    w_hh = jax.random.uniform(ks[1], (H, H), jnp.float32, -bound, bound)
    b_ih = jax.random.uniform(ks[2], (1, H), jnp.float32, -bound, bound)
    b_hh = jax.random.uniform(ks[3], (1, H), jnp.float32, -bound, bound)
    w_lin = jax.random.uniform(ks[4], (V, H), jnp.float32, -bound, bound)
    b_lin = jax.random.uniform(ks[5], (1, V), jnp.float32, -bound, bound)
    return (w_ih, w_hh, b_ih, b_hh, w_lin, b_lin)


if __name__ == "__main__":
    # Small shapes consistent with the module: batch=4, seq=8, vocab=16, hidden=32.
    B, T, V, H = 4, 8, 16, 32

    key = jax.random.PRNGKey(0)
    k_tok, k_par = jax.random.split(key)

    inputs = jax.random.randint(k_tok, (B, T), 0, V, dtype=jnp.int32)   # token ids
    state = jnp.zeros((1, B, H), jnp.float32)                           # begin_state
    params = init_params(k_par, V, H)

    output, new_state = rnn_model_forward(inputs, state, params, V, H)
    jax.block_until_ready((output, new_state))

    assert output.shape == (T * B, V) and output.dtype == jnp.float32
    assert new_state.shape == (1, B, H)

    # Pure-JAX reference mirroring the PyTorch module math.
    X = jax.nn.one_hot(inputs.T, V, dtype=jnp.float32)                  # (T, B, V)
    w_ih, w_hh, b_ih, b_hh, w_lin, b_lin = params

    def step(h, x_t):
        h_new = jnp.tanh(x_t @ w_ih.T + b_ih[0] + h @ w_hh.T + b_hh[0])
        return h_new, h_new

    h_last, Y = lax.scan(step, state[0], X)
    ref_out = Y.reshape(-1, H) @ w_lin.T + b_lin[0]
    assert jnp.allclose(output, ref_out, atol=1e-5, rtol=1e-5)
    assert jnp.allclose(new_state[0], h_last, atol=1e-5, rtol=1e-5)

    print("KERNEL_OK")
</pallas_src>

<mosaic_0001>
module attributes {stable_mosaic.version = 11 : i64} {
  func.func @rnn_fused_kernel(%arg0: i32, %arg1: memref<64x1xi32, #tpu.memory_space<vmem>>, %arg2: memref<128x128xf32, #tpu.memory_space<vmem>>, %arg3: memref<1x128xf32, #tpu.memory_space<vmem>>, %arg4: memref<8x128xf32, #tpu.memory_space<vmem>>, %arg5: memref<128x128xf32, #tpu.memory_space<vmem>>, %arg6: memref<128x128xf32, #tpu.memory_space<vmem>>, %arg7: memref<1x128xf32, #tpu.memory_space<vmem>>, %arg8: memref<64x128xf32, #tpu.memory_space<vmem>>, %arg9: memref<8x128xf32, #tpu.memory_space<vmem>>, %arg10: memref<8x128xf32, #tpu.memory_space<vmem>>, %arg11: memref<8x8x128xf32, #tpu.memory_space<vmem>>) attributes {dimension_semantics = [#tpu.dimension_semantics<arbitrary>], iteration_bounds = array<i64: 1>, scalar_prefetch = 0 : i64, scratch_operands = 2 : i64, tpu.core_type = #tpu.core_type<tc>, window_params = [{transform_indices = @transform_0, window_bounds = array<i64: 64, 1>}, {pipeline_mode = #tpu.pipeline_mode<synchronous>, transform_indices = @transform_1, window_bounds = array<i64: 128, 128>}, {pipeline_mode = #tpu.pipeline_mode<synchronous>, transform_indices = @transform_2, window_bounds = array<i64: 1, 128>}, {pipeline_mode = #tpu.pipeline_mode<synchronous>, transform_indices = @transform_3, window_bounds = array<i64: 8, 128>}, {pipeline_mode = #tpu.pipeline_mode<synchronous>, transform_indices = @transform_4, window_bounds = array<i64: 128, 128>}, {pipeline_mode = #tpu.pipeline_mode<synchronous>, transform_indices = @transform_5, window_bounds = array<i64: 128, 128>}, {pipeline_mode = #tpu.pipeline_mode<synchronous>, transform_indices = @transform_6, window_bounds = array<i64: 1, 128>}, {transform_indices = @transform_7, window_bounds = array<i64: 64, 128>}, {pipeline_mode = #tpu.pipeline_mode<synchronous>, transform_indices = @transform_8, window_bounds = array<i64: 8, 128>}]} {
    %c0_i32 = arith.constant 0 : i32
    %0 = arith.cmpi eq, %arg0, %c0_i32 : i32
    %1 = arith.extui %0 : i1 to i32
    %c0_i32_0 = arith.constant 0 : i32
    %2 = arith.cmpi ne, %1, %c0_i32_0 : i32
    scf.if %2 {
      %c0_82 = arith.constant 0 : index
      %c0_83 = arith.constant 0 : index
      %115 = vector.load %arg4[%c0_82, %c0_83] : memref<8x128xf32, #tpu.memory_space<vmem>>, vector<8x128xf32>
      %c0_84 = arith.constant 0 : index
      %c0_85 = arith.constant 0 : index
      %116 = vector.load %arg10[%c0_84, %c0_85] : memref<8x128xf32, #tpu.memory_space<vmem>>, vector<8x128xf32>
      tpu.vector_store %arg10[%c0_84, %c0_85], %115 {strides = array<i32>} : memref<8x128xf32, #tpu.memory_space<vmem>>, vector<8x128xf32>,
    } else {
    }
    %3 = tpu.iota {dimensions = array<i32: 1>} : vector<64x128xi32>
    %c0 = arith.constant 0 : index
    %c0_1 = arith.constant 0 : index
    %4 = vector.load %arg1[%c0, %c0_1] : memref<64x1xi32, #tpu.memory_space<vmem>>, vector<64x1xi32>
    %5 = vector.broadcast %4 : vector<64x1xi32> to vector<64x128xi32>
    %6 = arith.cmpi eq, %5, %3 : vector<64x128xi32>
    %7 = arith.extui %6 : vector<64x128xi1> to vector<64x128xi32>
    %8 = arith.sitofp %7 : vector<64x128xi32> to vector<64x128xf32>
    %c0_2 = arith.constant 0 : index
    %c0_3 = arith.constant 0 : index
    %9 = vector.load %arg2[%c0_2, %c0_3] : memref<128x128xf32, #tpu.memory_space<vmem>>, vector<128x128xf32>
    %cst = arith.constant dense<0.000000e+00> : vector<64x128xf32>
    %10 = tpu.matmul %8, %9, %cst {dimension_numbers = #tpu.dot_dimension_numbers<[1], [0], [0], [1], [0, 0, 1, 1], [], []>} : vector<64x128xf32>, vector<128x128xf32>, vector<64x128xf32> -> vector<64x128xf32>
    %c0_4 = arith.constant 0 : index
    %c0_5 = arith.constant 0 : index
    %11 = vector.load %arg3[%c0_4, %c0_5] : memref<1x128xf32, #tpu.memory_space<vmem>>, vector<1x128xf32>
    %12 = vector.broadcast %11 : vector<1x128xf32> to vector<64x128xf32>
    %13 = arith.addf %10, %12 : vector<64x128xf32>
    %14 = vector.shape_cast %13 : vector<64x128xf32> to vector<8x8x128xf32>
    %c0_6 = arith.constant 0 : index
    %c0_7 = arith.constant 0 : index
    %c0_8 = arith.constant 0 : index
    %15 = vector.load %arg11[%c0_6, %c0_7, %c0_8] : memref<8x8x128xf32, #tpu.memory_space<vmem>>, vector<8x8x128xf32>
    tpu.vector_store %arg11[%c0_6, %c0_7, %c0_8], %14 {strides = array<i32>} : memref<8x8x128xf32, #tpu.memory_space<vmem>>, vector<8x8x128xf32>,
    %c0_9 = arith.constant 0 : index
    %c0_10 = arith.constant 0 : index
    %16 = vector.load %arg10[%c0_9, %c0_10] : memref<8x128xf32, #tpu.memory_space<vmem>>, vector<8x128xf32>
    %c0_i32_11 = arith.constant 0 : i32
    %17 = arith.index_cast %c0_i32_11 : i32 to index
    %c0_12 = arith.constant 0 : index
    %c0_13 = arith.constant 0 : index
    %18 = vector.load %arg11[%17, %c0_12, %c0_13] : memref<8x8x128xf32, #tpu.memory_space<vmem>>, vector<1x8x128xf32>
    %19 = vector.shape_cast %18 : vector<1x8x128xf32> to vector<8x128xf32>
    %c0_14 = arith.constant 0 : index
    %c0_15 = arith.constant 0 : index
    %20 = vector.load %arg5[%c0_14, %c0_15] : memref<128x128xf32, #tpu.memory_space<vmem>>, vector<128x128xf32>
    %cst_16 = arith.constant dense<0.000000e+00> : vector<8x128xf32>
    %21 = tpu.matmul %16, %20, %cst_16 {dimension_numbers = #tpu.dot_dimension_numbers<[1], [0], [0], [1], [0, 0, 1, 1], [], []>} : vector<8x128xf32>, vector<128x128xf32>, vector<8x128xf32> -> vector<8x128xf32>
    %22 = arith.addf %19, %21 : vector<8x128xf32>
    %23 = math.tanh %22 : vector<8x128xf32>
    %24 = arith.index_cast %c0_i32_11 : i32 to index
    %c0_17 = arith.constant 0 : index
    %c0_18 = arith.constant 0 : index
    %25 = vector.load %arg11[%24, %c0_17, %c0_18] : memref<8x8x128xf32, #tpu.memory_space<vmem>>, vector<1x8x128xf32>
    %26 = vector.shape_cast %25 : vector<1x8x128xf32> to vector<8x128xf32>
    %27 = vector.shape_cast %23 : vector<8x128xf32> to vector<1x8x128xf32>
    tpu.vector_store %arg11[%24, %c0_17, %c0_18], %27 {strides = array<i32>} : memref<8x8x128xf32, #tpu.memory_space<vmem>>, vector<1x8x128xf32>,
    %c1_i32 = arith.constant 1 : i32
    %28 = arith.index_cast %c1_i32 : i32 to index
    %c0_19 = arith.constant 0 : index
    %c0_20 = arith.constant 0 : index
    %29 = vector.load %arg11[%28, %c0_19, %c0_20] : memref<8x8x128xf32, #tpu.memory_space<vmem>>, vector<1x8x128xf32>
    %30 = vector.shape_cast %29 : vector<1x8x128xf32> to vector<8x128xf32>
    %c0_21 = arith.constant 0 : index
    %c0_22 = arith.constant 0 : index
    %31 = vector.load %arg5[%c0_21, %c0_22] : memref<128x128xf32, #tpu.memory_space<vmem>>, vector<128x128xf32>
    %cst_23 = arith.constant dense<0.000000e+00> : vector<8x128xf32>
    %32 = tpu.matmul %23, %31, %cst_23 {dimension_numbers = #tpu.dot_dimension_numbers<[1], [0], [0], [1], [0, 0, 1, 1], [], []>} : vector<8x128xf32>, vector<128x128xf32>, vector<8x128xf32> -> vector<8x128xf32>
    %33 = arith.addf %30, %32 : vector<8x128xf32>
    %34 = math.tanh %33 : vector<8x128xf32>
    %35 = arith.index_cast %c1_i32 : i32 to index
    %c0_24 = arith.constant 0 : index
    %c0_25 = arith.constant 0 : index
    %36 = vector.load %arg11[%35, %c0_24, %c0_25] : memref<8x8x128xf32, #tpu.memory_space<vmem>>, vector<1x8x128xf32>
    %37 = vector.shape_cast %36 : vector<1x8x128xf32> to vector<8x128xf32>
    %38 = vector.shape_cast %34 : vector<8x128xf32> to vector<1x8x128xf32>
    tpu.vector_store %arg11[%35, %c0_24, %c0_25], %38 {strides = array<i32>} : memref<8x8x128xf32, #tpu.memory_space<vmem>>, vector<1x8x128xf32>,
    %c2_i32 = arith.constant 2 : i32
    %39 = arith.index_cast %c2_i32 : i32 to index
    %c0_26 = arith.constant 0 : index
    %c0_27 = arith.constant 0 : index
    %40 = vector.load %arg11[%39, %c0_26, %c0_27] : memref<8x8x128xf32, #tpu.memory_space<vmem>>, vector<1x8x128xf32>
    %41 = vector.shape_cast %40 : vector<1x8x128xf32> to vector<8x128xf32>
    %c0_28 = arith.constant 0 : index
    %c0_29 = arith.constant 0 : index
    %42 = vector.load %arg5[%c0_28, %c0_29] : memref<128x128xf32, #tpu.memory_space<vmem>>, vector<128x128xf32>
    %cst_30 = arith.constant dense<0.000000e+00> : vector<8x128xf32>
    %43 = tpu.matmul %34, %42, %cst_30 {dimension_numbers = #tpu.dot_dimension_numbers<[1], [0], [0], [1], [0, 0, 1, 1], [], []>} : vector<8x128xf32>, vector<128x128xf32>, vector<8x128xf32> -> vector<8x128xf32>
    %44 = arith.addf %41, %43 : vector<8x128xf32>
    %45 = math.tanh %44 : vector<8x128xf32>
    %46 = arith.index_cast %c2_i32 : i32 to index
    %c0_31 = arith.constant 0 : index
    %c0_32 = arith.constant 0 : index
    %47 = vector.load %arg11[%46, %c0_31, %c0_32] : memref<8x8x128xf32, #tpu.memory_space<vmem>>, vector<1x8x128xf32>
    %48 = vector.shape_cast %47 : vector<1x8x128xf32> to vector<8x128xf32>
    %49 = vector.shape_cast %45 : vector<8x128xf32> to vector<1x8x128xf32>
    tpu.vector_store %arg11[%46, %c0_31, %c0_32], %49 {strides = array<i32>} : memref<8x8x128xf32, #tpu.memory_space<vmem>>, vector<1x8x128xf32>,
    %c3_i32 = arith.constant 3 : i32
    %50 = arith.index_cast %c3_i32 : i32 to index
    %c0_33 = arith.constant 0 : index
    %c0_34 = arith.constant 0 : index
    %51 = vector.load %arg11[%50, %c0_33, %c0_34] : memref<8x8x128xf32, #tpu.memory_space<vmem>>, vector<1x8x128xf32>
    %52 = vector.shape_cast %51 : vector<1x8x128xf32> to vector<8x128xf32>
    %c0_35 = arith.constant 0 : index
    %c0_36 = arith.constant 0 : index
    %53 = vector.load %arg5[%c0_35, %c0_36] : memref<128x128xf32, #tpu.memory_space<vmem>>, vector<128x128xf32>
    %cst_37 = arith.constant dense<0.000000e+00> : vector<8x128xf32>
    %54 = tpu.matmul %45, %53, %cst_37 {dimension_numbers = #tpu.dot_dimension_numbers<[1], [0], [0], [1], [0, 0, 1, 1], [], []>} : vector<8x128xf32>, vector<128x128xf32>, vector<8x128xf32> -> vector<8x128xf32>
    %55 = arith.addf %52, %54 : vector<8x128xf32>
    %56 = math.tanh %55 : vector<8x128xf32>
    %57 = arith.index_cast %c3_i32 : i32 to index
    %c0_38 = arith.constant 0 : index
    %c0_39 = arith.constant 0 : index
    %58 = vector.load %arg11[%57, %c0_38, %c0_39] : memref<8x8x128xf32, #tpu.memory_space<vmem>>, vector<1x8x128xf32>
    %59 = vector.shape_cast %58 : vector<1x8x128xf32> to vector<8x128xf32>
    %60 = vector.shape_cast %56 : vector<8x128xf32> to vector<1x8x128xf32>
    tpu.vector_store %arg11[%57, %c0_38, %c0_39], %60 {strides = array<i32>} : memref<8x8x128xf32, #tpu.memory_space<vmem>>, vector<1x8x128xf32>,
    %c4_i32 = arith.constant 4 : i32
    %61 = arith.index_cast %c4_i32 : i32 to index
    %c0_40 = arith.constant 0 : index
    %c0_41 = arith.constant 0 : index
    %62 = vector.load %arg11[%61, %c0_40, %c0_41] : memref<8x8x128xf32, #tpu.memory_space<vmem>>, vector<1x8x128xf32>
    %63 = vector.shape_cast %62 : vector<1x8x128xf32> to vector<8x128xf32>
    %c0_42 = arith.constant 0 : index
    %c0_43 = arith.constant 0 : index
    %64 = vector.load %arg5[%c0_42, %c0_43] : memref<128x128xf32, #tpu.memory_space<vmem>>, vector<128x128xf32>
    %cst_44 = arith.constant dense<0.000000e+00> : vector<8x128xf32>
    %65 = tpu.matmul %56, %64, %cst_44 {dimension_numbers = #tpu.dot_dimension_numbers<[1], [0], [0], [1], [0, 0, 1, 1], [], []>} : vector<8x128xf32>, vector<128x128xf32>, vector<8x128xf32> -> vector<8x128xf32>
    %66 = arith.addf %63, %65 : vector<8x128xf32>
    %67 = math.tanh %66 : vector<8x128xf32>
    %68 = arith.index_cast %c4_i32 : i32 to index
    %c0_45 = arith.constant 0 : index
    %c0_46 = arith.constant 0 : index
    %69 = vector.load %arg11[%68, %c0_45, %c0_46] : memref<8x8x128xf32, #tpu.memory_space<vmem>>, vector<1x8x128xf32>
    %70 = vector.shape_cast %69 : vector<1x8x128xf32> to vector<8x128xf32>
    %71 = vector.shape_cast %67 : vector<8x128xf32> to vector<1x8x128xf32>
    tpu.vector_store %arg11[%68, %c0_45, %c0_46], %71 {strides = array<i32>} : memref<8x8x128xf32, #tpu.memory_space<vmem>>, vector<1x8x128xf32>,
    %c5_i32 = arith.constant 5 : i32
    %72 = arith.index_cast %c5_i32 : i32 to index
    %c0_47 = arith.constant 0 : index
    %c0_48 = arith.constant 0 : index
    %73 = vector.load %arg11[%72, %c0_47, %c0_48] : memref<8x8x128xf32, #tpu.memory_space<vmem>>, vector<1x8x128xf32>
    %74 = vector.shape_cast %73 : vector<1x8x128xf32> to vector<8x128xf32>
    %c0_49 = arith.constant 0 : index
    %c0_50 = arith.constant 0 : index
    %75 = vector.load %arg5[%c0_49, %c0_50] : memref<128x128xf32, #tpu.memory_space<vmem>>, vector<128x128xf32>
    %cst_51 = arith.constant dense<0.000000e+00> : vector<8x128xf32>
    %76 = tpu.matmul %67, %75, %cst_51 {dimension_numbers = #tpu.dot_dimension_numbers<[1], [0], [0], [1], [0, 0, 1, 1], [], []>} : vector<8x128xf32>, vector<128x128xf32>, vector<8x128xf32> -> vector<8x128xf32>
    %77 = arith.addf %74, %76 : vector<8x128xf32>
    %78 = math.tanh %77 : vector<8x128xf32>
    %79 = arith.index_cast %c5_i32 : i32 to index
    %c0_52 = arith.constant 0 : index
    %c0_53 = arith.constant 0 : index
    %80 = vector.load %arg11[%79, %c0_52, %c0_53] : memref<8x8x128xf32, #tpu.memory_space<vmem>>, vector<1x8x128xf32>
    %81 = vector.shape_cast %80 : vector<1x8x128xf32> to vector<8x128xf32>
    %82 = vector.shape_cast %78 : vector<8x128xf32> to vector<1x8x128xf32>
    tpu.vector_store %arg11[%79, %c0_52, %c0_53], %82 {strides = array<i32>} : memref<8x8x128xf32, #tpu.memory_space<vmem>>, vector<1x8x128xf32>,
    %c6_i32 = arith.constant 6 : i32
    %83 = arith.index_cast %c6_i32 : i32 to index
    %c0_54 = arith.constant 0 : index
    %c0_55 = arith.constant 0 : index
    %84 = vector.load %arg11[%83, %c0_54, %c0_55] : memref<8x8x128xf32, #tpu.memory_space<vmem>>, vector<1x8x128xf32>
    %85 = vector.shape_cast %84 : vector<1x8x128xf32> to vector<8x128xf32>
    %c0_56 = arith.constant 0 : index
    %c0_57 = arith.constant 0 : index
    %86 = vector.load %arg5[%c0_56, %c0_57] : memref<128x128xf32, #tpu.memory_space<vmem>>, vector<128x128xf32>
    %cst_58 = arith.constant dense<0.000000e+00> : vector<8x128xf32>
    %87 = tpu.matmul %78, %86, %cst_58 {dimension_numbers = #tpu.dot_dimension_numbers<[1], [0], [0], [1], [0, 0, 1, 1], [], []>} : vector<8x128xf32>, vector<128x128xf32>, vector<8x128xf32> -> vector<8x128xf32>
    %88 = arith.addf %85, %87 : vector<8x128xf32>
    %89 = math.tanh %88 : vector<8x128xf32>
    %90 = arith.index_cast %c6_i32 : i32 to index
    %c0_59 = arith.constant 0 : index
    %c0_60 = arith.constant 0 : index
    %91 = vector.load %arg11[%90, %c0_59, %c0_60] : memref<8x8x128xf32, #tpu.memory_space<vmem>>, vector<1x8x128xf32>
    %92 = vector.shape_cast %91 : vector<1x8x128xf32> to vector<8x128xf32>
    %93 = vector.shape_cast %89 : vector<8x128xf32> to vector<1x8x128xf32>
    tpu.vector_store %arg11[%90, %c0_59, %c0_60], %93 {strides = array<i32>} : memref<8x8x128xf32, #tpu.memory_space<vmem>>, vector<1x8x128xf32>,
    %c7_i32 = arith.constant 7 : i32
    %94 = arith.index_cast %c7_i32 : i32 to index
    %c0_61 = arith.constant 0 : index
    %c0_62 = arith.constant 0 : index
    %95 = vector.load %arg11[%94, %c0_61, %c0_62] : memref<8x8x128xf32, #tpu.memory_space<vmem>>, vector<1x8x128xf32>
    %96 = vector.shape_cast %95 : vector<1x8x128xf32> to vector<8x128xf32>
    %c0_63 = arith.constant 0 : index
    %c0_64 = arith.constant 0 : index
    %97 = vector.load %arg5[%c0_63, %c0_64] : memref<128x128xf32, #tpu.memory_space<vmem>>, vector<128x128xf32>
    %cst_65 = arith.constant dense<0.000000e+00> : vector<8x128xf32>
    %98 = tpu.matmul %89, %97, %cst_65 {dimension_numbers = #tpu.dot_dimension_numbers<[1], [0], [0], [1], [0, 0, 1, 1], [], []>} : vector<8x128xf32>, vector<128x128xf32>, vector<8x128xf32> -> vector<8x128xf32>
    %99 = arith.addf %96, %98 : vector<8x128xf32>
    %100 = math.tanh %99 : vector<8x128xf32>
    %101 = arith.index_cast %c7_i32 : i32 to index
    %c0_66 = arith.constant 0 : index
    %c0_67 = arith.constant 0 : index
    %102 = vector.load %arg11[%101, %c0_66, %c0_67] : memref<8x8x128xf32, #tpu.memory_space<vmem>>, vector<1x8x128xf32>
    %103 = vector.shape_cast %102 : vector<1x8x128xf32> to vector<8x128xf32>
    %104 = vector.shape_cast %100 : vector<8x128xf32> to vector<1x8x128xf32>
    tpu.vector_store %arg11[%101, %c0_66, %c0_67], %104 {strides = array<i32>} : memref<8x8x128xf32, #tpu.memory_space<vmem>>, vector<1x8x128xf32>,
    %c8_i32 = arith.constant 8 : i32
    %c0_68 = arith.constant 0 : index
    %c0_69 = arith.constant 0 : index
    %105 = vector.load %arg10[%c0_68, %c0_69] : memref<8x128xf32, #tpu.memory_space<vmem>>, vector<8x128xf32>
    tpu.vector_store %arg10[%c0_68, %c0_69], %100 {strides = array<i32>} : memref<8x128xf32, #tpu.memory_space<vmem>>, vector<8x128xf32>,
    %c0_70 = arith.constant 0 : index
    %c0_71 = arith.constant 0 : index
    %106 = vector.load %arg9[%c0_70, %c0_71] : memref<8x128xf32, #tpu.memory_space<vmem>>, vector<8x128xf32>
    tpu.vector_store %arg9[%c0_70, %c0_71], %100 {strides = array<i32>} : memref<8x128xf32, #tpu.memory_space<vmem>>, vector<8x128xf32>,
    %c0_72 = arith.constant 0 : index
    %c0_73 = arith.constant 0 : index
    %c0_74 = arith.constant 0 : index
    %107 = vector.load %arg11[%c0_72, %c0_73, %c0_74] : memref<8x8x128xf32, #tpu.memory_space<vmem>>, vector<8x8x128xf32>
    %108 = vector.shape_cast %107 : vector<8x8x128xf32> to vector<64x128xf32>
    %c0_75 = arith.constant 0 : index
    %c0_76 = arith.constant 0 : index
    %109 = vector.load %arg6[%c0_75, %c0_76] : memref<128x128xf32, #tpu.memory_space<vmem>>, vector<128x128xf32>
    %cst_77 = arith.constant dense<0.000000e+00> : vector<64x128xf32>
    %110 = tpu.matmul %108, %109, %cst_77 {dimension_numbers = #tpu.dot_dimension_numbers<[1], [0], [0], [1], [0, 0, 1, 1], [], []>} : vector<64x128xf32>, vector<128x128xf32>, vector<64x128xf32> -> vector<64x128xf32>
    %c0_78 = arith.constant 0 : index
    %c0_79 = arith.constant 0 : index
    %111 = vector.load %arg7[%c0_78, %c0_79] : memref<1x128xf32, #tpu.memory_space<vmem>>, vector<1x128xf32>
    %112 = vector.broadcast %111 : vector<1x128xf32> to vector<64x128xf32>
    %113 = arith.addf %110, %112 : vector<64x128xf32>
    %c0_80 = arith.constant 0 : index
    %c0_81 = arith.constant 0 : index
    %114 = vector.load %arg8[%c0_80, %c0_81] : memref<64x128xf32, #tpu.memory_space<vmem>>, vector<64x128xf32>
    tpu.vector_store %arg8[%c0_80, %c0_81], %113 {strides = array<i32>} : memref<64x128xf32, #tpu.memory_space<vmem>>, vector<64x128xf32>,
    return
  }
  func.func @transform_0(%arg0: i32) -> (i32, i32) {
    %c0_i32 = arith.constant 0 : i32
    %c0_i32_0 = arith.constant 0 : i32
    return %arg0, %c0_i32 : i32, i32
  }
  func.func @transform_1(%arg0: i32) -> (i32, i32) {
    %c0_i32 = arith.constant 0 : i32
    %c0_i32_0 = arith.constant 0 : i32
    %c0_i32_1 = arith.constant 0 : i32
    return %c0_i32, %c0_i32_0 : i32, i32
  }
  func.func @transform_2(%arg0: i32) -> (i32, i32) {
    %c0_i32 = arith.constant 0 : i32
    %c0_i32_0 = arith.constant 0 : i32
    %c0_i32_1 = arith.constant 0 : i32
    return %c0_i32, %c0_i32_0 : i32, i32
  }
  func.func @transform_3(%arg0: i32) -> (i32, i32) {
    %c0_i32 = arith.constant 0 : i32
    %c0_i32_0 = arith.constant 0 : i32
    %c0_i32_1 = arith.constant 0 : i32
    return %c0_i32, %c0_i32_0 : i32, i32
  }
  func.func @transform_4(%arg0: i32) -> (i32, i32) {
    %c0_i32 = arith.constant 0 : i32
    %c0_i32_0 = arith.constant 0 : i32
    %c0_i32_1 = arith.constant 0 : i32
    return %c0_i32, %c0_i32_0 : i32, i32
  }
  func.func @transform_5(%arg0: i32) -> (i32, i32) {
    %c0_i32 = arith.constant 0 : i32
    %c0_i32_0 = arith.constant 0 : i32
    %c0_i32_1 = arith.constant 0 : i32
    return %c0_i32, %c0_i32_0 : i32, i32
  }
  func.func @transform_6(%arg0: i32) -> (i32, i32) {
    %c0_i32 = arith.constant 0 : i32
    %c0_i32_0 = arith.constant 0 : i32
    %c0_i32_1 = arith.constant 0 : i32
    return %c0_i32, %c0_i32_0 : i32, i32
  }
  func.func @transform_7(%arg0: i32) -> (i32, i32) {
    %c0_i32 = arith.constant 0 : i32
    %c0_i32_0 = arith.constant 0 : i32
    return %arg0, %c0_i32 : i32, i32
  }
  func.func @transform_8(%arg0: i32) -> (i32, i32) {
    %c0_i32 = arith.constant 0 : i32
    %c0_i32_0 = arith.constant 0 : i32
    %c0_i32_1 = arith.constant 0 : i32
    return %c0_i32, %c0_i32_0 : i32, i32
  }
}

</mosaic_0001>

<bundles_post_ra>
// kernel: tpu_custom_call.1
= control target key start
LH: loop header
LB: loop body
LE: loop exit
PB: predicated region body
PF: predicated region fallthrough
CT: control target
= control target key end

     0   :  { %14 = vsyncpa [#allocation5], 0  ;;  %s2515_s0 = inlined_call_operand.vmem [shape: s32[64,1], index: 0, kind: input, shape index: {}]   ;;  %s2516_s1 = inlined_call_operand.hbm [shape: f32[128,128], index: 1, kind: input, shape index: {}]   ;;  %s2517_s2 = inlined_call_operand.vmem [shape: f32[1,128], index: 2, kind: input, shape index: {}]   ;;  %s2518_s3 = inlined_call_operand.vmem [shape: f32[8,128], index: 3, kind: input, shape index: {}]   ;;  %s2519_s4 = inlined_call_operand.hbm [shape: f32[128,128], index: 4, kind: input, shape index: {}]   ;;  %s2520_s5 = inlined_call_operand.hbm [shape: f32[128,128], index: 5, kind: input, shape index: {}]   ;;  %s2521_s6 = inlined_call_operand.vmem [shape: f32[1,128], index: 6, kind: input, shape index: {}]   ;;  %s2522_s7 = inlined_call_operand.hbm [shape: f32[64,128], index: 7, kind: output, shape index: {0}]   ;;  %s2523_s8 = inlined_call_operand.hbm [shape: f32[8,128], index: 8, kind: output, shape index: {1}]  }
   0x1   :  { %15 = vsyncpa [#allocation8], 0 }
   0x2   :  { %16 = vsyncpa [#allocation6], 0 }
   0x3   :  { %17 = vsyncpa [#allocation12], 0  ;;  %s2151_s27 = smov [#allocation7]   ;;  %s2152_s29 = smov [#allocation4]  }
   0x4   :  { %s41_s28 = sshll.u32 %s2151_s27, 4  ;;  %s25_s30 = sshll.u32 %s2152_s29, 4  ;;  %s42_s28 = int_to_ptr.vmem [resolvable:$true] %s41_s28  ;;  %s2208_s30 = int_to_ptr.vmem [resolvable:$true] %s25_s30 }
   0x5   :  { %s2033_s11 = scalar_lea.hbm %s2519_s4, 2048 }
   0x6   :  { %p2034_p0 = scmp.ne.s32.totalorder %s2519_s4, %s2033_s11  ;;  %p2037_p1 = scmp.lt.u32.totalorder %s2033_s11, %s2519_s4 }
   0x8   :  { %p2039_p2 = pnand %p2037_p1, %p2034_p0 }
   0xa   :  { %2042 = shalt.err (!%p2039_p2)
}
   0xb   :  { %s2043_s16 = scalar_lea.vmem %s42_s28, 2048  ;;  %p2048_p4 = scmp.lt.s32.totalorder %s42_s28, %s42_s28 }
   0xc   :  { %p2044_p3 = scmp.ne.s32.totalorder %s42_s28, %s2043_s16  ;;  %p2049_p5 = scmp.lt.s32.totalorder %s2043_s16, %s2043_s16 }
   0xe   :  { %p2050_p6 = por %p2049_p5, %p2048_p4 }
  0x10   :  { %p2051_p7 = pnand %p2050_p6, %p2044_p3 }
  0x12   :  { %2054 = shalt.err (!%p2051_p7)
}
  0x13   :  { %s2153_s17 = smov 128   ;;  %s2154_s18 = smov 8  }
  0x14   :  { %47 = dma.hbm_to_vmem [thread:$0]  %s2519_s4, 2048, %s42_s28, [#allocation8], %s2153_s17, %s2153_s17, %s2154_s18  }
  0x15   :  { %s2055_s23 = scalar_lea.hbm %s2516_s1, 2048 }
  0x16   :  { %p2056_p8 = scmp.ne.s32.totalorder %s2516_s1, %s2055_s23  ;;  %p2059_p9 = scmp.lt.u32.totalorder %s2055_s23, %s2516_s1 }
  0x18   :  { %p2061_p10 = pnand %p2059_p9, %p2056_p8 }
  0x1a   :  { %2064 = shalt.err (!%p2061_p10)
}
  0x1b   :  { %s2065_s29 = scalar_lea.vmem %s2208_s30, 2048  ;;  %p2070_p12 = scmp.lt.s32.totalorder %s2208_s30, %s2208_s30 }
  0x1c   :  { %p2066_p11 = scmp.ne.s32.totalorder %s2208_s30, %s2065_s29  ;;  %p2071_p13 = scmp.lt.s32.totalorder %s2065_s29, %s2065_s29 }
  0x1e   :  { %p2072_p0 = por %p2071_p13, %p2070_p12 }
  0x20   :  { %p2073_p1 = pnand %p2072_p0, %p2066_p11 }
  0x22   :  { %2076 = shalt.err (!%p2073_p1)
}
  0x23   :  { %31 = dma.hbm_to_vmem [thread:$0]  %s2516_s1, 2048, %s2208_s30, [#allocation5], %s2153_s17, %s2153_s17, %s2154_s18  }
  0x24   :  { %s2155_s9 = smov [#allocation9]   ;;  %s2077_s13 = scalar_lea.hbm %s2520_s5, 2048 }
  0x25   :  { %s53_s10 = sshll.u32 %s2155_s9, 4  ;;  %p2078_p2 = scmp.ne.s32.totalorder %s2520_s5, %s2077_s13  ;;  %s54_s10 = int_to_ptr.vmem [resolvable:$true] %s53_s10 }
  0x26   :  { %p2081_p3 = scmp.lt.u32.totalorder %s2077_s13, %s2520_s5 }
  0x28   :  { %p2083_p4 = pnand %p2081_p3, %p2078_p2 }
  0x2a   :  { %2086 = shalt.err (!%p2083_p4)
}
  0x2b   :  { %s2087_s20 = scalar_lea.vmem %s54_s10, 2048  ;;  %p2092_p6 = scmp.lt.s32.totalorder %s54_s10, %s54_s10 }
  0x2c   :  { %p2088_p5 = scmp.ne.s32.totalorder %s54_s10, %s2087_s20  ;;  %p2093_p7 = scmp.lt.s32.totalorder %s2087_s20, %s2087_s20 }
  0x2e   :  { %p2094_p8 = por %p2093_p7, %p2092_p6 }
  0x30   :  { %p2095_p9 = pnand %p2094_p8, %p2088_p5 }
  0x32   :  { %2098 = shalt.err (!%p2095_p9)
}
  0x33   :  { %59 = dma.hbm_to_vmem [thread:$0]  %s2520_s5, 2048, %s54_s10, [#allocation8], %s2153_s17, %s2153_s17, %s2154_s18  }
  0x34   :  { %2143 = dma.done.wait [#allocation5], 2048  }
  0x35   :  { %2144 = vsyncadd [#allocation5], 4294965248 }
  0x36   :  { %2145 = dma.done.wait [#allocation8], 4096  }
  0x37   :  { %2146 = vsyncadd [#allocation8], 4294963200  ;;  %v2156_v0 = vmov 0   ;;  %v2157_v1 = vmov 0.0|0.0   ;;  %v79_v2 = vld [vmem:[%s2515_s0] sm:$0xff]  ;;  %v81_v3 = vld [vmem:[%s2515_s0 + $0x10] sm:$0xff]  ;;  %v77_v60 = vlaneseq }
  0x38   :  { %2015 = vset.pattern.permute.xlu0 %v2156_v0  ;;  %2016 = vset.pattern.permute.xlu1 %v2156_v0  ;;  %v80_v4 = vld [vmem:[%s2515_s0 + $0x8] sm:$0xff]  ;;  %v82_v5 = vld [vmem:[%s2515_s0 + $0x18] sm:$0xff]  ;;  %v135_v6 = vld [vmem:[#allocation4] sm:$0xff]  ;;  %vm2158_vm0 = vmmov 0   ;;  %v2159_v25 = vmov 0.0   ;;  %v2160_v0 = vmov 1.0  }
  0x39   :  { %1779 = vmatprep.subr.bf16.mxu1 %v2157_v1  ;;  %88 = vperm.xlu0 %2015, %v79_v2   ;;  %v136_v7 = vld [vmem:[#allocation4 + $0x8] sm:$0xff]  ;;  %v273_v9 = vld [vmem:[#allocation7] sm:$0xff]  ;;  %v137_v11 = vld [vmem:[#allocation4 + $0x10] sm:$0xff]  ;;  %v78_v61 = vand.u32 127, %v77_v60 }
  0x3a   :  { %94 = vperm.xlu1 %2016, %v81_v3   ;;  %v1747_v8 = vpack.c.bf16 %v136_v7, %v135_v6  ;;  %v274_v10 = vld [vmem:[#allocation7 + $0x8] sm:$0xff]  ;;  %v138_v13 = vld [vmem:[#allocation4 + $0x18] sm:$0xff]  ;;  %v275_v14 = vld [vmem:[#allocation7 + $0x10] sm:$0xff]  ;;  %1455 = vmatprep.mubr.msk.f32.mxu1 %vm2158_vm0, %v2159_v25 }
  0x3b   :  { %v2273_v12 = vpack.c.bf16 %v274_v10, %v273_v9  ;;  %v276_v15 = vld [vmem:[#allocation7 + $0x18] sm:$0xff]  ;;  %v1751_v16 = vpack.c.bf16 %v138_v13, %v137_v11  ;;  %v139_v17 = vld [vmem:[#allocation4 + $0x20] sm:$0xff]  ;;  %v140_v18 = vld [vmem:[#allocation4 + $0x28] sm:$0xff] }
  0x3c   :  { %v83_v19 = vld [vmem:[%s2515_s0 + $0x20] sm:$0xff]  ;;  %v84_v20 = vld [vmem:[%s2515_s0 + $0x28] sm:$0xff]  ;;  %1748 = vmatprep.subr.bf16.mxu0 %v1747_v8  ;;  %v2282_v21 = vpack.c.bf16 %v276_v15, %v275_v14  ;;  %v1755_v24 = vpack.c.bf16 %v140_v18, %v139_v17  ;;  %v141_v26 = vld [vmem:[#allocation4 + $0x30] sm:$0xff] }
  0x3d   :  { %91 = vperm.xlu0 %2015, %v80_v4   ;;  %1781 = vmatpush3.bf16.msra.mxu1 %v2273_v12  ;;  %v277_v22 = vld [vmem:[#allocation7 + $0x20] sm:$0xff]  ;;  %v278_v23 = vld [vmem:[#allocation7 + $0x28] sm:$0xff]  ;;  %v142_v27 = vld [vmem:[#allocation4 + $0x38] sm:$0xff] }
  0x3e   :  { %97 = vperm.xlu1 %2016, %v82_v5   ;;  %1750 = vmatpush3.bf16.msra.mxu0 %v1747_v8  ;;  %v85_v28 = vld [vmem:[%s2515_s0 + $0x30] sm:$0xff]  ;;  %v2291_v29 = vpack.c.bf16 %v278_v23, %v277_v22  ;;  %v280_v31 = vld [vmem:[#allocation7 + $0x38] sm:$0xff]  ;;  %v1759_v32 = vpack.c.bf16 %v142_v27, %v141_v26  ;;  %v143_v33 = vld [vmem:[#allocation4 + $0x40] sm:$0xff] }
  0x3f   :  { %1782 = vmatprep.subr.bf16.mxu1 %v2157_v1  ;;  %1752 = vmatprep.subr.bf16.mxu0 %v1751_v16  ;;  %v279_v30 = vld [vmem:[#allocation7 + $0x30] sm:$0xff]  ;;  %v144_v34 = vld [vmem:[#allocation4 + $0x48] sm:$0xff]  ;;  %v281_v36 = vld [vmem:[#allocation7 + $0x40] sm:$0xff] }
  0x40   :  { %v2295_v35 = vpack.c.bf16 %v280_v31, %v279_v30  ;;  %v282_v37 = vld [vmem:[#allocation7 + $0x48] sm:$0xff]  ;;  %v86_v38 = vld [vmem:[%s2515_s0 + $0x38] sm:$0xff]  ;;  %v1763_v39 = vpack.c.bf16 %v144_v34, %v143_v33  ;;  %v145_v40 = vld [vmem:[#allocation4 + $0x50] sm:$0xff] }
  0x41   :  { %100 = vperm.xlu0 %2015, %v83_v19   ;;  %1784 = vmatpush3.bf16.msra.mxu1 %v2282_v21  ;;  %v146_v41 = vld [vmem:[#allocation4 + $0x58] sm:$0xff]  ;;  %v2302_v42 = vpack.c.bf16 %v282_v37, %v281_v36  ;;  %v283_v43 = vld [vmem:[#allocation7 + $0x50] sm:$0xff]  ;;  %v147_v46 = vld [vmem:[#allocation4 + $0x60] sm:$0xff] }
  0x42   :  { %103 = vperm.xlu1 %2016, %v84_v20   ;;  %1754 = vmatpush3.bf16.msra.mxu0 %v1751_v16  ;;  %v284_v44 = vld [vmem:[#allocation7 + $0x58] sm:$0xff]  ;;  %v1767_v45 = vpack.c.bf16 %v146_v41, %v145_v40  ;;  %v148_v47 = vld [vmem:[#allocation4 + $0x68] sm:$0xff]  ;;  %v285_v49 = vld [vmem:[#allocation7 + $0x60] sm:$0xff] }
  0x43   :  { %1785 = vmatprep.subr.bf16.mxu1 %v2157_v1  ;;  %1756 = vmatprep.subr.bf16.mxu0 %v1755_v24  ;;  %v2306_v48 = vpack.c.bf16 %v284_v44, %v283_v43  ;;  %v286_v50 = vld [vmem:[#allocation7 + $0x68] sm:$0xff]  ;;  %v1771_v51 = vpack.c.bf16 %v148_v47, %v147_v46  ;;  %v149_v52 = vld [vmem:[#allocation4 + $0x70] sm:$0xff]  ;;  %v150_v53 = vld [vmem:[#allocation4 + $0x78] sm:$0xff] }
  0x44   :  { %v2310_v54 = vpack.c.bf16 %v286_v50, %v285_v49  ;;  %v287_v55 = vld [vmem:[#allocation7 + $0x70] sm:$0xff]  ;;  %v288_v56 = vld [vmem:[#allocation7 + $0x78] sm:$0xff]  ;;  %v1775_v57 = vpack.c.bf16 %v150_v53, %v149_v52  ;;  %v75_v59 = vld [vmem:[%s2518_s3] sm:$0xff] }
  0x45   :  { %106 = vperm.xlu0 %2015, %v85_v28   ;;  %1787 = vmatpush3.bf16.msra.mxu1 %v2291_v29  ;;  %v2314_v58 = vpack.c.bf16 %v288_v56, %v287_v55  ;;  %v1185_v10 = vld [vmem:[%s2517_s2] ss:$0 sm:$0xff]  ;;  %v1011_v52 = vld [vmem:[#allocation9 + $0x10] sm:$0xff]  ;;  %v1012_v53 = vld [vmem:[#allocation9 + $0x18] sm:$0xff] }
  0x46   :  { %1758 = vmatpush3.bf16.msra.mxu0 %v1755_v24  ;;  %1788 = vmatprep.subr.bf16.mxu1 %v2157_v1  ;;  %v1013_v56 = vld [vmem:[#allocation9 + $0x20] sm:$0xff] }
  0x47   :  { %1760 = vmatprep.subr.bf16.mxu0 %v1759_v32  ;;  %109 = vperm.xlu1 %2016, %v86_v38   ;;  %v1017_v60 = vld [vmem:[#allocation9 + $0x40] sm:$0xff] }
  0x49   :  { %1790 = vmatpush3.bf16.msra.mxu1 %v2295_v35 }
  0x4a   :  { %1762 = vmatpush3.bf16.msra.mxu0 %v1759_v32  ;;  %1791 = vmatprep.subr.bf16.mxu1 %v2157_v1 }
  0x4b   :  { %1764 = vmatprep.subr.bf16.mxu0 %v1763_v39 }
  0x4d   :  { %1793 = vmatpush3.bf16.msra.mxu1 %v2302_v42 }
  0x4e   :  { %1766 = vmatpush3.bf16.msra.mxu0 %v1763_v39  ;;  %1794 = vmatprep.subr.bf16.mxu1 %v2157_v1 }
  0x4f   :  { %1768 = vmatprep.subr.bf16.mxu0 %v1767_v45 }
  0x51   :  { %1796 = vmatpush3.bf16.msra.mxu1 %v2306_v48 }
  0x52   :  { %1770 = vmatpush3.bf16.msra.mxu0 %v1767_v45  ;;  %1797 = vmatprep.subr.bf16.mxu1 %v2157_v1 }
  0x53   :  { %1772 = vmatprep.subr.bf16.mxu0 %v1771_v51 }
  0x55   :  { %1799 = vmatpush3.bf16.msra.mxu1 %v2310_v54 }
  0x56   :  { %1774 = vmatpush3.bf16.msra.mxu0 %v1771_v51  ;;  %1800 = vmatprep.subr.bf16.mxu1 %v2157_v1 }
  0x57   :  { %1776 = vmatprep.subr.bf16.mxu0 %v1775_v57 }
  0x59   :  { %1802 = vmatpush3.bf16.msra.mxu1 %v2314_v58 }
  0x5a   :  { %1778 = vmatpush3.bf16.msra.mxu0 %v1775_v57  ;;  %1827 = vmatprep.subr.bf16.mxu1 %v2157_v1  ;;  %v1014_v57 = vld [vmem:[#allocation9 + $0x28] sm:$0xff] }
  0x5b   :  { %1803 = vmatprep.subr.bf16.mxu0 %v2157_v1 }
  0x5c   :  { %1456 = vmatmul.mubr.f32.vlgmr.msra.gmra.mrb[0].mxu1 %v75_v59 }
  0x5d   :  { %1829 = vmatpush3.bf16.msra.mxu1 %v2273_v12  ;;  %1525 = vmatprep.mubr.msk.f32.mxu1 %vm2158_vm0, %v2159_v25 }
  0x5e   :  { %1830 = vmatprep.subr.bf16.mxu1 %v2157_v1 }
  0x61   :  { %1832 = vmatpush3.bf16.msra.mxu1 %v2282_v21 }
  0x62   :  { %1833 = vmatprep.subr.bf16.mxu1 %v2157_v1 }
  0x65   :  { %1835 = vmatpush3.bf16.msra.mxu1 %v2291_v29 }
  0x66   :  { %1836 = vmatprep.subr.bf16.mxu1 %v2157_v1 }
  0x69   :  { %1838 = vmatpush3.bf16.msra.mxu1 %v2295_v35 }
  0x6a   :  { %1839 = vmatprep.subr.bf16.mxu1 %v2157_v1 }
  0x6d   :  { %1841 = vmatpush3.bf16.msra.mxu1 %v2302_v42 }
  0x6e   :  { %1842 = vmatprep.subr.bf16.mxu1 %v2157_v1 }
  0x71   :  { %1844 = vmatpush3.bf16.msra.mxu1 %v2306_v48 }
  0x72   :  { %1845 = vmatprep.subr.bf16.mxu1 %v2157_v1 }
  0x75   :  { %1847 = vmatpush3.bf16.msra.mxu1 %v2310_v54 }
  0x76   :  { %1848 = vmatprep.subr.bf16.mxu1 %v2157_v1 }
  0x79   :  { %1850 = vmatpush3.bf16.msra.mxu1 %v2314_v58 }
  0x7a   :  { %1875 = vmatprep.subr.bf16.mxu1 %v2157_v1 }
  0xb8   :  { %v89_v62 = vpop.permute.xlu0 %88 }
  0xb9   :  { %v95_v63 = vpop.permute.xlu1 %94  ;;  %vm111_vm1 = vcmp.eq.s32.totalorder %v89_v62, %v78_v61 }
  0xba   :  { %1411 = vmatprep.mubr.msk.f32.mxu0 %vm111_vm1, %v2160_v0  ;;  %vm113_vm2 = vcmp.eq.s32.totalorder %v95_v63, %v78_v61  ;;  %v1019_v63 = vld [vmem:[#allocation9 + $0x50] sm:$0xff] }
  0xbc   :  { %v92_v2 = vpop.permute.xlu0 %91 }
  0xbd   :  { %v98_v3 = vpop.permute.xlu1 %97  ;;  %vm112_vm3 = vcmp.eq.s32.totalorder %v92_v2, %v78_v61 }
  0xbe   :  { %1412 = vmatmul.mubr.msk.f32.vlgmr.msra.gmra.mrb[0].mxu0 %vm112_vm3, %v2160_v0  ;;  %vm114_vm4 = vcmp.eq.s32.totalorder %v98_v3, %v78_v61  ;;  %v1021_v3 = vld [vmem:[#allocation9 + $0x60] sm:$0xff] }
  0xbf   :  { %1414 = vmatprep.mubr.msk.f32.mxu0 %vm113_vm2, %v2160_v0  ;;  %1805 = vmatpush3.bf16.msra.mxu0 %v2273_v12 }
  0xc0   :  { %v101_v4 = vpop.permute.xlu0 %100  ;;  %1806 = vmatprep.subr.bf16.mxu0 %v2157_v1 }
  0xc1   :  { %v104_v5 = vpop.permute.xlu1 %103  ;;  %vm115_vm5 = vcmp.eq.s32.totalorder %v101_v4, %v78_v61  ;;  %v1022_v4 = vld [vmem:[#allocation9 + $0x68] sm:$0xff] }
  0xc2   :  { %1415 = vmatmul.mubr.msk.f32.gmra.mrb[2].mxu0 %vm114_vm4, %v2160_v0  ;;  %vm116_vm6 = vcmp.eq.s32.totalorder %v104_v5, %v78_v61  ;;  %v1995_v5 = vpack.c.bf16 %v1022_v4, %v1021_v3 }
  0xc3   :  { %1417 = vmatprep.mubr.msk.f32.mxu0 %vm115_vm5, %v2160_v0  ;;  %1808 = vmatpush3.bf16.msra.mxu0 %v2282_v21 }
  0xc4   :  { %v107_v6 = vpop.permute.xlu0 %106  ;;  %1809 = vmatprep.subr.bf16.mxu0 %v2157_v1 }
  0xc5   :  { %vm117_vm7 = vcmp.eq.s32.totalorder %v107_v6, %v78_v61  ;;  %v1023_v6 = vld [vmem:[#allocation9 + $0x70] sm:$0xff] }
  0xc6   :  { %1418 = vmatmul.mubr.msk.f32.gmra.mrb[4].mxu0 %vm116_vm6, %v2160_v0  ;;  %v110_v7 = vpop.permute.xlu1 %109 }
  0xc7   :  { %1420 = vmatprep.mubr.msk.f32.mxu0 %vm117_vm7, %v2160_v0  ;;  %1811 = vmatpush3.bf16.msra.mxu0 %v2291_v29  ;;  %vm118_vm8 = vcmp.eq.s32.totalorder %v110_v7, %v78_v61  ;;  %v1018_v61 = vld [vmem:[#allocation9 + $0x48] sm:$0xff]  ;;  %v1024_v7 = vld [vmem:[#allocation9 + $0x78] sm:$0xff] }
  0xc8   :  { %1812 = vmatprep.subr.bf16.mxu0 %v2157_v1  ;;  %v1987_v62 = vpack.c.bf16 %v1018_v61, %v1017_v60 }
  0xca   :  { %1421 = vmatmul.mubr.msk.f32.gmra.mrb[6].mxu0 %vm118_vm8, %v2160_v0  ;;  %v1020_v0 = vld [vmem:[#allocation9 + $0x58] sm:$0xff] }
  0xcb   :  { %1814 = vmatpush3.bf16.msra.mxu0 %v2295_v35  ;;  %1490 = vmatprep.mubr.msk.f32.mxu0 %vm2158_vm0, %v2159_v25  ;;  %v1991_v2 = vpack.c.bf16 %v1020_v0, %v1019_v63 }
  0xcc   :  { %1815 = vmatprep.subr.bf16.mxu0 %v2157_v1 }
  0xcf   :  { %1817 = vmatpush3.bf16.msra.mxu0 %v2302_v42 }
  0xd0   :  { %1818 = vmatprep.subr.bf16.mxu0 %v2157_v1 }
  0xd3   :  { %1820 = vmatpush3.bf16.msra.mxu0 %v2306_v48 }
  0xd4   :  { %1821 = vmatprep.subr.bf16.mxu0 %v2157_v1 }
  0xd7   :  { %1823 = vmatpush3.bf16.msra.mxu0 %v2310_v54 }
  0xd8   :  { %1824 = vmatprep.subr.bf16.mxu0 %v2157_v1 }
  0xdb   :  { %1826 = vmatpush3.bf16.msra.mxu0 %v2314_v58 }
  0xdc   :  { %1851 = vmatprep.subr.bf16.mxu0 %v2157_v1 }
 0x12f   :  { %v355_v8 = vpop.f32.mrb[0].mxu1 }
 0x130   :  { %v1457_v9 = vpop.f32.mrb[1].mxu1 }
 0x191   :  { %v1413_v11 = vpop.f32.mrb[0].mxu0 }
 0x192   :  { %v230_v13 = vadd.f32 %v1413_v11, %v1185_v10  ;;  %v224_v14 = vpop.f32.mrb[1].mxu0 }
 0x193   :  { %v225_v15 = vadd.f32 %v1185_v10, %v224_v14  ;;  %v1194_v14 = vld [vmem:[%s2521_s6] ss:$0 sm:$0xff]  ;;  %s2161_s6 = smov [#allocation11]  }
 0x194   :  { %s1163_s19 = sshll.u32 %s2161_s6, 4  ;;  %s1164_s19 = int_to_ptr.vmem [resolvable:$true] %s1163_s19 }
 0x195   :  { %v359_v16 = vadd.f32 %v355_v8, %v225_v15  ;;  %v1416_v17 = vpop.f32.mrb[2].mxu0  ;;  %v1999_v8 = vpack.c.bf16 %v1024_v7, %v1023_v6  ;;  %s2099_s20 = scalar_lea.vmem %s1164_s19, 128  ;;  %p2104_p11 = scmp.lt.s32.totalorder %s1164_s19, %s1164_s19 }
 0x196   :  { %v2362_v18 = vadd.f32 %v1416_v17, %v1185_v10  ;;  %v234_v19 = vpop.f32.mrb[3].mxu0  ;;  %p2100_p10 = scmp.ne.s32.totalorder %s1164_s19, %s2099_s20  ;;  %p2105_p12 = scmp.lt.s32.totalorder %s2099_s20, %s2099_s20 }
 0x197   :  { %2017 = vtanh.f32 %v359_v16  ;;  %v235_v20 = vadd.f32 %v1185_v10, %v234_v19 }
 0x198   :  { %p2106_p13 = por %p2105_p12, %p2104_p11 }
 0x199   :  { %v1419_v22 = vpop.f32.mrb[4].mxu0 }
 0x19a   :  { %v2364_v23 = vadd.f32 %v1419_v22, %v1185_v10  ;;  %v244_v24 = vpop.f32.mrb[5].mxu0  ;;  %p2107_p0 = pnand %p2106_p13, %p2100_p10 }
 0x19b   :  { %v2366_v26 = vadd.f32 %v1185_v10, %v244_v24 }
 0x19d   :  { %v1422_v27 = vpop.f32.mrb[6].mxu0 }
 0x19e   :  { %v2368_v28 = vadd.f32 %v1422_v27, %v1185_v10  ;;  %v254_v30 = vpop.f32.mrb[7].mxu0 }
 0x19f   :  { %v2370_v31 = vadd.f32 %v1185_v10, %v254_v30 }
 0x1a1   :  { %v2372_v32 = vpop.eup %2017 }
 0x1a2   :  { %1491 = vmatmul.mubr.f32.vlgmr.msra.gmra.mrb[8].mxu0 %v2372_v32 }
 0x1a3   :  { %1853 = vmatpush3.bf16.msra.mxu0 %v2273_v12  ;;  %1560 = vmatprep.mubr.msk.f32.mxu0 %vm2158_vm0, %v2159_v25 }
 0x1a4   :  { %1854 = vmatprep.subr.bf16.mxu0 %v2157_v1 }
 0x1a7   :  { %1856 = vmatpush3.bf16.msra.mxu0 %v2282_v21 }
 0x1a8   :  { %1857 = vmatprep.subr.bf16.mxu0 %v2157_v1 }
 0x1ab   :  { %1859 = vmatpush3.bf16.msra.mxu0 %v2291_v29 }
 0x1ac   :  { %1860 = vmatprep.subr.bf16.mxu0 %v2157_v1 }
 0x1af   :  { %1862 = vmatpush3.bf16.msra.mxu0 %v2295_v35 }
 0x1b0   :  { %1863 = vmatprep.subr.bf16.mxu0 %v2157_v1 }
 0x1b3   :  { %1865 = vmatpush3.bf16.msra.mxu0 %v2302_v42 }
 0x1b4   :  { %1866 = vmatprep.subr.bf16.mxu0 %v2157_v1 }
 0x1b7   :  { %1868 = vmatpush3.bf16.msra.mxu0 %v2306_v48 }
 0x1b8   :  { %1869 = vmatprep.subr.bf16.mxu0 %v2157_v1 }
 0x1bb   :  { %1871 = vmatpush3.bf16.msra.mxu0 %v2310_v54 }
 0x1bc   :  { %1872 = vmatprep.subr.bf16.mxu0 %v2157_v1 }
 0x1bf   :  { %1874 = vmatpush3.bf16.msra.mxu0 %v2314_v58 }
 0x1c0   :  { %1899 = vmatprep.subr.bf16.mxu0 %v2157_v1 }
 0x275   :  { %v446_v33 = vpop.f32.mrb[8].mxu0 }
 0x276   :  { %v450_v34 = vadd.f32 %v446_v33, %v230_v13  ;;  %v1492_v36 = vpop.f32.mrb[9].mxu0 }
 0x278   :  { %2019 = vtanh.f32 %v450_v34 }
 0x282   :  { %v2393_v37 = vpop.eup %2019 }
 0x283   :  { %1526 = vmatmul.mubr.f32.vlgmr.msra.gmra.mrb[2].mxu1 %v2393_v37 }
 0x284   :  { %1877 = vmatpush3.bf16.msra.mxu1 %v2273_v12  ;;  %1595 = vmatprep.mubr.msk.f32.mxu1 %vm2158_vm0, %v2159_v25 }
 0x285   :  { %1878 = vmatprep.subr.bf16.mxu1 %v2157_v1 }
 0x288   :  { %1880 = vmatpush3.bf16.msra.mxu1 %v2282_v21 }
 0x289   :  { %1881 = vmatprep.subr.bf16.mxu1 %v2157_v1 }
 0x28c   :  { %1883 = vmatpush3.bf16.msra.mxu1 %v2291_v29 }
 0x28d   :  { %1884 = vmatprep.subr.bf16.mxu1 %v2157_v1 }
 0x290   :  { %1886 = vmatpush3.bf16.msra.mxu1 %v2295_v35 }
 0x291   :  { %1887 = vmatprep.subr.bf16.mxu1 %v2157_v1 }
 0x294   :  { %1889 = vmatpush3.bf16.msra.mxu1 %v2302_v42 }
 0x295   :  { %1890 = vmatprep.subr.bf16.mxu1 %v2157_v1 }
 0x298   :  { %1892 = vmatpush3.bf16.msra.mxu1 %v2306_v48 }
 0x299   :  { %1893 = vmatprep.subr.bf16.mxu1 %v2157_v1 }
 0x29c   :  { %1895 = vmatpush3.bf16.msra.mxu1 %v2310_v54 }
 0x29d   :  { %1896 = vmatprep.subr.bf16.mxu1 %v2157_v1 }
 0x2a0   :  { %1898 = vmatpush3.bf16.msra.mxu1 %v2314_v58 }
 0x2a1   :  { %1923 = vmatprep.subr.bf16.mxu1 %v2157_v1 }
 0x356   :  { %v537_v38 = vpop.f32.mrb[2].mxu1 }
 0x357   :  { %v541_v39 = vadd.f32 %v537_v38, %v235_v20  ;;  %v1527_v40 = vpop.f32.mrb[3].mxu1 }
 0x359   :  { %2021 = vtanh.f32 %v541_v39 }
 0x363   :  { %v2414_v41 = vpop.eup %2021 }
 0x364   :  { %1561 = vmatmul.mubr.f32.vlgmr.msra.gmra.mrb[10].mxu0 %v2414_v41 }
 0x365   :  { %1901 = vmatpush3.bf16.msra.mxu0 %v2273_v12  ;;  %1630 = vmatprep.mubr.msk.f32.mxu0 %vm2158_vm0, %v2159_v25 }
 0x366   :  { %1902 = vmatprep.subr.bf16.mxu0 %v2157_v1 }
 0x369   :  { %1904 = vmatpush3.bf16.msra.mxu0 %v2282_v21 }
 0x36a   :  { %1905 = vmatprep.subr.bf16.mxu0 %v2157_v1 }
 0x36d   :  { %1907 = vmatpush3.bf16.msra.mxu0 %v2291_v29 }
 0x36e   :  { %1908 = vmatprep.subr.bf16.mxu0 %v2157_v1 }
 0x371   :  { %1910 = vmatpush3.bf16.msra.mxu0 %v2295_v35 }
 0x372   :  { %1911 = vmatprep.subr.bf16.mxu0 %v2157_v1 }
 0x375   :  { %1913 = vmatpush3.bf16.msra.mxu0 %v2302_v42 }
 0x376   :  { %1914 = vmatprep.subr.bf16.mxu0 %v2157_v1 }
 0x379   :  { %1916 = vmatpush3.bf16.msra.mxu0 %v2306_v48 }
 0x37a   :  { %1917 = vmatprep.subr.bf16.mxu0 %v2157_v1 }
 0x37d   :  { %1919 = vmatpush3.bf16.msra.mxu0 %v2310_v54 }
 0x37e   :  { %1920 = vmatprep.subr.bf16.mxu0 %v2157_v1 }
 0x381   :  { %1922 = vmatpush3.bf16.msra.mxu0 %v2314_v58 }
 0x382   :  { %1947 = vmatprep.subr.bf16.mxu0 %v2157_v1 }
 0x437   :  { %v628_v43 = vpop.f32.mrb[10].mxu0 }
 0x438   :  { %v632_v44 = vadd.f32 %v628_v43, %v2362_v18  ;;  %v1562_v45 = vpop.f32.mrb[11].mxu0 }
 0x43a   :  { %2023 = vtanh.f32 %v632_v44 }
 0x444   :  { %v2436_v46 = vpop.eup %2023 }
 0x445   :  { %1596 = vmatmul.mubr.f32.vlgmr.msra.gmra.mrb[4].mxu1 %v2436_v46 }
 0x446   :  { %1925 = vmatpush3.bf16.msra.mxu1 %v2273_v12  ;;  %1665 = vmatprep.mubr.msk.f32.mxu1 %vm2158_vm0, %v2159_v25 }
 0x447   :  { %1926 = vmatprep.subr.bf16.mxu1 %v2157_v1 }
 0x44a   :  { %1928 = vmatpush3.bf16.msra.mxu1 %v2282_v21 }
 0x44b   :  { %1929 = vmatprep.subr.bf16.mxu1 %v2157_v1 }
 0x44e   :  { %1931 = vmatpush3.bf16.msra.mxu1 %v2291_v29 }
 0x44f   :  { %1932 = vmatprep.subr.bf16.mxu1 %v2157_v1 }
 0x452   :  { %1934 = vmatpush3.bf16.msra.mxu1 %v2295_v35 }
 0x453   :  { %1935 = vmatprep.subr.bf16.mxu1 %v2157_v1 }
 0x456   :  { %1937 = vmatpush3.bf16.msra.mxu1 %v2302_v42 }
 0x457   :  { %1938 = vmatprep.subr.bf16.mxu1 %v2157_v1 }
 0x45a   :  { %1940 = vmatpush3.bf16.msra.mxu1 %v2306_v48 }
 0x45b   :  { %1941 = vmatprep.subr.bf16.mxu1 %v2157_v1 }
 0x45e   :  { %1943 = vmatpush3.bf16.msra.mxu1 %v2310_v54 }
 0x45f   :  { %1944 = vmatprep.subr.bf16.mxu1 %v2157_v1 }
 0x462   :  { %1946 = vmatpush3.bf16.msra.mxu1 %v2314_v58 }
 0x518   :  { %v719_v47 = vpop.f32.mrb[4].mxu1 }
 0x519   :  { %v723_v49 = vadd.f32 %v719_v47, %v2366_v26  ;;  %v1597_v50 = vpop.f32.mrb[5].mxu1 }
 0x51b   :  { %2025 = vtanh.f32 %v723_v49 }
 0x525   :  { %v2457_v51 = vpop.eup %2025 }
 0x526   :  { %1631 = vmatmul.mubr.f32.vlgmr.msra.gmra.mrb[12].mxu0 %v2457_v51 }
 0x527   :  { %1949 = vmatpush3.bf16.msra.mxu0 %v2273_v12  ;;  %1700 = vmatprep.mubr.msk.f32.mxu0 %vm2158_vm0, %v2159_v25  ;;  %v1009_v12 = vld [vmem:[#allocation9] sm:$0xff] }
 0x528   :  { %1950 = vmatprep.subr.bf16.mxu0 %v2157_v1 }
 0x52b   :  { %1952 = vmatpush3.bf16.msra.mxu0 %v2282_v21  ;;  %v1010_v21 = vld [vmem:[#allocation9 + $0x8] sm:$0xff] }
 0x52c   :  { %1953 = vmatprep.subr.bf16.mxu0 %v2157_v1  ;;  %v1971_v25 = vpack.c.bf16 %v1010_v21, %v1009_v12 }
 0x52e   :  { %1972 = vmatprep.subr.bf16.mxu1 %v1971_v25 }
 0x52f   :  { %1955 = vmatpush3.bf16.msra.mxu0 %v2291_v29 }
 0x530   :  { %1956 = vmatprep.subr.bf16.mxu0 %v2157_v1 }
 0x533   :  { %1958 = vmatpush3.bf16.msra.mxu0 %v2295_v35 }
 0x534   :  { %1959 = vmatprep.subr.bf16.mxu0 %v2157_v1 }
 0x537   :  { %1961 = vmatpush3.bf16.msra.mxu0 %v2302_v42 }
 0x538   :  { %1962 = vmatprep.subr.bf16.mxu0 %v2157_v1 }
 0x53b   :  { %1964 = vmatpush3.bf16.msra.mxu0 %v2306_v48  ;;  %v1975_v48 = vpack.c.bf16 %v1012_v53, %v1011_v52 }
 0x53c   :  { %1965 = vmatprep.subr.bf16.mxu0 %v2157_v1 }
 0x53f   :  { %1967 = vmatpush3.bf16.msra.mxu0 %v2310_v54  ;;  %v1015_v54 = vld [vmem:[#allocation9 + $0x30] sm:$0xff] }
 0x540   :  { %1968 = vmatprep.subr.bf16.mxu0 %v2157_v1  ;;  %v1979_v1 = vpack.c.bf16 %v1014_v57, %v1013_v56 }
 0x543   :  { %1970 = vmatpush3.bf16.msra.mxu0 %v2314_v58  ;;  %v1016_v58 = vld [vmem:[#allocation9 + $0x38] sm:$0xff] }
 0x544   :  { %v1983_v59 = vpack.c.bf16 %v1016_v58, %v1015_v54 }
 0x5f9   :  { %v810_v29 = vpop.f32.mrb[12].mxu0 }
 0x5fa   :  { %v814_v35 = vadd.f32 %v810_v29, %v2364_v23  ;;  %v1632_v42 = vpop.f32.mrb[13].mxu0 }
 0x5fc   :  { %2027 = vtanh.f32 %v814_v35 }
 0x606   :  { %v2028_v55 = vpop.eup %2027 }
 0x607   :  { %1666 = vmatmul.mubr.f32.vlgmr.msra.gmra.mrb[6].mxu1 %v2028_v55 }
 0x608   :  { %1974 = vmatpush3.bf16.msra.mxu1 %v1971_v25  ;;  %1735 = vmatprep.mubr.f32.mxu1 %v2372_v32 }
 0x609   :  { %1976 = vmatprep.subr.bf16.mxu1 %v1975_v48 }
 0x60c   :  { %1978 = vmatpush3.bf16.msra.mxu1 %v1975_v48 }
 0x60d   :  { %1980 = vmatprep.subr.bf16.mxu1 %v1979_v1 }
 0x610   :  { %1982 = vmatpush3.bf16.msra.mxu1 %v1979_v1 }
 0x611   :  { %1984 = vmatprep.subr.bf16.mxu1 %v1983_v59 }
 0x614   :  { %1986 = vmatpush3.bf16.msra.mxu1 %v1983_v59 }
 0x615   :  { %1988 = vmatprep.subr.bf16.mxu1 %v1987_v62 }
 0x618   :  { %1990 = vmatpush3.bf16.msra.mxu1 %v1987_v62 }
 0x619   :  { %1992 = vmatprep.subr.bf16.mxu1 %v1991_v2 }
 0x61c   :  { %1994 = vmatpush3.bf16.msra.mxu1 %v1991_v2 }
 0x61d   :  { %1996 = vmatprep.subr.bf16.mxu1 %v1995_v5 }
 0x620   :  { %1998 = vmatpush3.bf16.msra.mxu1 %v1995_v5 }
 0x621   :  { %2000 = vmatprep.subr.bf16.mxu1 %v1999_v8 }
 0x624   :  { %2002 = vmatpush3.bf16.msra.mxu1 %v1999_v8 }
 0x627   :  { %1736 = vmatmul.mubr.f32.vlgmr.msra.gmra.mrb[8].mxu1 %v2393_v37 }
 0x628   :  { %1738 = vmatprep.mubr.f32.mxu1 %v2414_v41 }
 0x62b   :  { %1739 = vmatmul.mubr.f32.gmra.mrb[10].mxu1 %v2436_v46 }
 0x62c   :  { %1741 = vmatprep.mubr.f32.mxu1 %v2457_v51 }
 0x62f   :  { %1742 = vmatmul.mubr.f32.gmra.mrb[12].mxu1 %v2028_v55 }
 0x6da   :  { %v901_v9 = vpop.f32.mrb[6].mxu1 }
 0x6db   :  { %v905_v10 = vadd.f32 %v901_v9, %v2370_v31  ;;  %v1667_v11 = vpop.f32.mrb[7].mxu1 }
 0x6dd   :  { %2029 = vtanh.f32 %v905_v10 }
 0x6e7   :  { %v2030_v13 = vpop.eup %2029 }
 0x6e8   :  { %1701 = vmatmul.mubr.f32.vlgmr.msra.gmra.mrb[14].mxu0 %v2030_v13  ;;  %1744 = vmatprep.mubr.f32.mxu1 %v2030_v13 }
 0x6fa   :  { %v1737_v15 = vpop.f32.mrb[8].mxu1 }
 0x6fb   :  { %v1104_v16 = vadd.f32 %v1737_v15, %v1194_v14  ;;  %v1098_v17 = vpop.f32.mrb[9].mxu1 }
 0x6fc   :  { %v1099_v18 = vadd.f32 %v1194_v14, %v1098_v17 }
 0x6fd   :  { %1138 = vst [vmem:[#allocation10 + $0x8] sm:$0xff] %v1104_v16 }
 0x6fe   :  { %1137 = vst [vmem:[#allocation10] sm:$0xff] %v1099_v18  ;;  %v1740_v19 = vpop.f32.mrb[10].mxu1 }
 0x6ff   :  { %v1114_v20 = vadd.f32 %v1740_v19, %v1194_v14  ;;  %v1108_v22 = vpop.f32.mrb[11].mxu1 }
 0x700   :  { %v1109_v23 = vadd.f32 %v1194_v14, %v1108_v22 }
 0x701   :  { %1140 = vst [vmem:[#allocation10 + $0x18] sm:$0xff] %v1114_v20 }
 0x702   :  { %1139 = vst [vmem:[#allocation10 + $0x10] sm:$0xff] %v1109_v23  ;;  %v1743_v24 = vpop.f32.mrb[12].mxu1 }
 0x703   :  { %v1124_v26 = vadd.f32 %v1743_v24, %v1194_v14  ;;  %v1118_v27 = vpop.f32.mrb[13].mxu1 }
 0x704   :  { %v1119_v30 = vadd.f32 %v1194_v14, %v1118_v27 }
 0x705   :  { %1142 = vst [vmem:[#allocation10 + $0x28] sm:$0xff] %v1124_v26 }
 0x706   :  { %1141 = vst [vmem:[#allocation10 + $0x20] sm:$0xff] %v1119_v30 }
 0x7bb   :  { %v992_v31 = vpop.f32.mrb[14].mxu0 }
 0x7bc   :  { %v996_v32 = vadd.f32 %v992_v31, %v2368_v28  ;;  %v1702_v33 = vpop.f32.mrb[15].mxu0 }
 0x7be   :  { %2031 = vtanh.f32 %v996_v32 }
 0x7c8   :  { %v2032_v34 = vpop.eup %2031 }
 0x7c9   :  { %1000 = vst [vmem:[#allocation11] sm:$0xff] %v2032_v34  ;;  %1745 = vmatmul.mubr.f32.gmra.mrb[14].mxu1 %v2032_v34 }
 0x7ca   :  { %2110 = shalt.err (!%p2107_p0)
}
 0x7cb   :  { %s2111_s21 = scalar_lea.hbm %s2523_s8, 128 }
 0x7cc   :  { %p2112_p1 = scmp.ne.s32.totalorder %s2523_s8, %s2111_s21  ;;  %p2115_p2 = scmp.lt.u32.totalorder %s2111_s21, %s2523_s8 }
 0x7ce   :  { %p2117_p3 = pnand %p2115_p2, %p2112_p1 }
 0x7d0   :  { %2120 = shalt.err (!%p2117_p3)
}
 0x7d1   :  { %1166 = dma.vmem_to_hbm [thread:$0]  %s1164_s19, 128, %s2523_s8, [#allocation12]  }
 0x7d2   :  { %s2162_s27 = smov [#allocation10]  }
 0x7d3   :  { %s1150_s29 = sshll.u32 %s2162_s27, 4  ;;  %s1151_s29 = int_to_ptr.vmem [resolvable:$true] %s1150_s29 }
 0x7d4   :  { %s2121_s4 = scalar_lea.vmem %s1151_s29, 1024  ;;  %p2126_p5 = scmp.lt.s32.totalorder %s1151_s29, %s1151_s29 }
 0x7d5   :  { %p2122_p4 = scmp.ne.s32.totalorder %s1151_s29, %s2121_s4  ;;  %p2127_p6 = scmp.lt.s32.totalorder %s2121_s4, %s2121_s4 }
 0x7d7   :  { %p2128_p7 = por %p2127_p6, %p2126_p5 }
 0x7d9   :  { %p2129_p8 = pnand %p2128_p7, %p2122_p4 }
 0x89c   :  { %v1746_v28 = vpop.f32.mrb[14].mxu1 }
 0x89d   :  { %v1134_v36 = vadd.f32 %v1746_v28, %v1194_v14  ;;  %v1128_v37 = vpop.f32.mrb[15].mxu1 }
 0x89e   :  { %v1129_v38 = vadd.f32 %v1194_v14, %v1128_v37 }
 0x89f   :  { %1144 = vst [vmem:[#allocation10 + $0x38] sm:$0xff] %v1134_v36 }
 0x8a0   :  { %1143 = vst [vmem:[#allocation10 + $0x30] sm:$0xff] %v1129_v38 }
 0x8a1   :  { %2132 = shalt.err (!%p2129_p8)
}
 0x8a2   :  { %s2133_s8 = scalar_lea.hbm %s2522_s7, 1024 }
 0x8a3   :  { %p2134_p9 = scmp.ne.s32.totalorder %s2522_s7, %s2133_s8  ;;  %p2137_p10 = scmp.lt.u32.totalorder %s2133_s8, %s2522_s7 }
 0x8a5   :  { %p2139_p11 = pnand %p2137_p10, %p2134_p9 }
 0x8a7   :  { %2142 = shalt.err (!%p2139_p11)
}
 0x8a8   :  { %1156 = dma.vmem_to_hbm [thread:$0]  %s1151_s29, 1024, %s2522_s7, [#allocation6], %s2153_s17, %s2153_s17, %s2154_s18  }
 0x8a9   :  { %2147 = dma.done.wait [#allocation6], 1024  }
 0x8aa   :  { %2148 = vsyncadd [#allocation6], 4294966272 }
 0x8ab   :  { %2149 = dma.done.wait [#allocation12], 128  }
 0x8ac   :  { %2150 = vsyncadd [#allocation12], 4294967168 }
 0x8ad   :  { %1173 = vsyncpa [#allocation5], 1 }
 0x8ae   :  { %1174 = vsyncpa [#allocation8], 1 }
 0x8af   :  { %1175 = vsyncpa [#allocation6], 1 }
 0x8b0   :  { %1176 = vsyncpa [#allocation12], 1 }

</bundles_post_ra>
